<compile_context>
chip_gen: v5e
topology: v5e:2x2
jax: 0.10.0
libtpu: 0.0.40
codegen_flags: <defaults>
</compile_context>

<pallas_src>
import math

import jax
import jax.numpy as jnp
from jax.experimental import pallas as pl
from jax.experimental.pallas import tpu as pltpu


def _round_up(v, m):
    return (v + m - 1) // m * m


def _vmem_budget_bytes():
    """Per-generation scoped-VMEM budget with headroom."""
    phys = 64 * 2**20
    try:
        info = pltpu.get_tpu_info()
        phys = int(getattr(info, "vmem_capacity_bytes", phys))
    except Exception:
        pass
    if phys >= 100 * 2**20:      # v5e / v6e: 128 MiB physical
        return 100 * 2**20
    return 48 * 2**20            # v7x: 64 MiB physical, leave ~16 MiB headroom


# --------------------------------------------------------------------------
# Kernels
# --------------------------------------------------------------------------
def _fused_gcn_kernel(adj_ref, s1_ref, w2_ref, out_ref):
    """Small-graph path: everything VMEM-resident, adj read from HBM once."""
    adj = adj_ref[...]
    h = jnp.maximum(
        jnp.dot(adj, s1_ref[...], preferred_element_type=jnp.float32), 0.0)
    s2 = jnp.dot(h.astype(w2_ref.dtype), w2_ref[...],
                 preferred_element_type=jnp.float32)
    out_ref[...] = jnp.dot(adj, s2.astype(w2_ref.dtype),
                           preferred_element_type=jnp.float32
                           ).astype(out_ref.dtype)


def _gc_layer0_kernel(adj_ref, s1_ref, w2_ref, s2_ref):
    """s2 row block = relu(adj_tile @ support1) @ W2 (support2 fused per tile)."""
    h = jnp.maximum(
        jnp.dot(adj_ref[...], s1_ref[...], preferred_element_type=jnp.float32),
        0.0)
    s2_ref[...] = jnp.dot(h.astype(w2_ref.dtype), w2_ref[...],
                          preferred_element_type=jnp.float32
                          ).astype(s2_ref.dtype)


def _gc_layer1_kernel(adj_ref, s2_ref, out_ref):
    """out row block = adj_tile @ support2."""
    out_ref[...] = jnp.dot(adj_ref[...], s2_ref[...],
                           preferred_element_type=jnp.float32
                           ).astype(out_ref.dtype)


# --------------------------------------------------------------------------
# Wrapper
# --------------------------------------------------------------------------
def gcn_forward(x, adj, w1, w2, *, dropout=0.0, compute_dtype=jnp.bfloat16,
                tm_max=None, force_tiled=False):
    """2-layer GCN forward: adj @ (relu(adj @ (x @ w1)) @ w2)."""
    if dropout != 0.0:
        # TODO(synk): nonzero dropout would need pltpu.prng_seed /
        # prng_random_bits in-kernel; the DSTG default (dropout=0.0) is identity.
        raise NotImplementedError("gcn_forward only supports dropout == 0.0")

    x = jnp.asarray(x, jnp.float32)
    adj = jnp.asarray(adj, jnp.float32)
    w1 = jnp.asarray(w1, jnp.float32)
    w2 = jnp.asarray(w2, jnp.float32)

    n, f = x.shape
    assert adj.shape == (n, n)
    assert w1.shape[0] == f
    h1 = w1.shape[1]
    assert w2.shape[0] == h1
    nout = w2.shape[1]

    dt = compute_dtype
    dsz = jnp.dtype(dt).itemsize
    h1p = _round_up(h1, 128)
    noutp = _round_up(nout, 128)
    np8 = _round_up(n, 8)

    # Layer-1 feature matmul hoisted out of the kernel (removes the resident x
    # buffer and the serial first-step matmul inside the adj pipeline).
    s1 = jnp.dot(x, w1)                                   # (n, h1), f32 via XLA

    budget = _vmem_budget_bytes()

    # Footprint estimate if everything (incl. adj) is held resident in VMEM.
    fused_est = (np8 * np8 * dsz        # adj
                 + np8 * h1p * dsz      # support1
                 + h1p * noutp * dsz    # w2
                 + np8 * noutp * 4      # out (f32)
                 + np8 * h1p * 4        # h intermediate (f32)
                 + np8 * noutp * 4)     # s2 intermediate (f32)
    use_fused = (not force_tiled) and (fused_est * 5) // 4 <= budget

    if use_fused:
        # ---------------- small-graph fused path (adj resident, read once) --
        np_ = np8
        adj_p = jnp.zeros((np_, np_), dt).at[:n, :n].set(adj.astype(dt))
        s1_p = jnp.zeros((np_, h1p), dt).at[:n, :h1].set(s1.astype(dt))
        w2_p = jnp.zeros((h1p, noutp), dt).at[:h1, :nout].set(w2.astype(dt))

        out = pl.pallas_call(
            _fused_gcn_kernel,
            out_shape=jax.ShapeDtypeStruct((np_, noutp), jnp.float32),
            compiler_params=pltpu.CompilerParams(vmem_limit_bytes=budget),
        )(adj_p, s1_p, w2_p)
        return out[:n, :nout]

    # ------------------- large-graph streamed two-pass path -----------------
    nbuf = 3                                   # 3-deep adj buffer
    # Resident operands (assume double-buffered by the pipeline to be safe):
    resident = 2 * (np8 * h1p + h1p * noutp + np8 * noutp) * dsz
    avail = max(budget - resident - (4 << 20), 2 << 20)
    denom = nbuf * np8 * dsz + 2 * noutp * (4 + dsz)      # adj tiles + out tiles
    tm_cap = max(int(avail // denom), 8)
    if tm_max is not None:
        tm_cap = min(tm_cap, int(tm_max))
    tm_cap = min(tm_cap, np8)

    nt = pl.cdiv(np8, tm_cap)
    tm = _round_up(pl.cdiv(np8, nt), 8)
    np_ = tm * nt

    adj_p = jnp.zeros((np_, np_), dt).at[:n, :n].set(adj.astype(dt))
    s1_p = jnp.zeros((np_, h1p), dt).at[:n, :h1].set(s1.astype(dt))
    w2_p = jnp.zeros((h1p, noutp), dt).at[:h1, :nout].set(w2.astype(dt))

    if nt >= 3:
        # Deeper adj pipeline keeps the DMA stream ahead through long steps.
        adj_spec = pl.BlockSpec((tm, np_), lambda i: (i, 0),
                                pipeline_mode=pl.Buffered(nbuf))
    else:
        adj_spec = pl.BlockSpec((tm, np_), lambda i: (i, 0))

    cparams = pltpu.CompilerParams(
        dimension_semantics=("parallel",),     # megacore sharding on v7x
        vmem_limit_bytes=budget,
    )

    # Pass 0: s2 = relu(adj @ s1) @ W2, support2 computed per adj row tile.
    s2 = pl.pallas_call(
        _gc_layer0_kernel,
        out_shape=jax.ShapeDtypeStruct((np_, noutp), dt),
        grid=(nt,),
        in_specs=[
            adj_spec,
            pl.BlockSpec((np_, h1p), lambda i: (0, 0)),      # support1 resident
            pl.BlockSpec((h1p, noutp), lambda i: (0, 0)),    # w2 resident
        ],
        out_specs=pl.BlockSpec((tm, noutp), lambda i: (i, 0)),
        compiler_params=cparams,
    )(adj_p, s1_p, w2_p)

    # Pass 1: out = adj @ s2.  (The 2x adj HBM stream is unavoidable once adj
    # doesn't fit VMEM: layer 1 needs the complete s2 from layer 0.)
    out = pl.pallas_call(
        _gc_layer1_kernel,
        out_shape=jax.ShapeDtypeStruct((np_, noutp), jnp.float32),
        grid=(nt,),
        in_specs=[
            adj_spec,
            pl.BlockSpec((np_, noutp), lambda i: (0, 0)),    # support2 resident
        ],
        out_specs=pl.BlockSpec((tm, noutp), lambda i: (i, 0)),
        compiler_params=cparams,
    )(adj_p, s2)

    return out[:n, :nout]


# --------------------------------------------------------------------------
# Reference / test harness
# --------------------------------------------------------------------------
def _init_weight(key, fan_in, fan_out):
    # Matches GraphConvolution.reset_parameters: U(-r, r), r = sqrt(6/(in+out))
    init_range = math.sqrt(6.0 / (fan_in + fan_out))
    return jax.random.uniform(key, (fan_in, fan_out), dtype=jnp.float32,
                              minval=-init_range, maxval=init_range)


def _ref_forward(x, adj, w1, w2):
    h = jnp.maximum(adj @ (x @ w1), 0.0)
    return adj @ (h @ w2)


def _make_inputs(key, n, nfeat, nhid1, nout):
    kx, kadj, kw1, kw2 = jax.random.split(key, 4)
    x = jax.random.normal(kx, (n, nfeat), dtype=jnp.float32)
    # Dense row-normalized adjacency (stand-in for the sparse support matrix).
    adj_raw = (jax.random.uniform(kadj, (n, n)) > 0.8).astype(jnp.float32)
    adj_raw = adj_raw + jnp.eye(n, dtype=jnp.float32)
    adj = adj_raw / jnp.sum(adj_raw, axis=1, keepdims=True)
    w1 = _init_weight(kw1, nfeat, nhid1)
    w2 = _init_weight(kw2, nhid1, nout)
    return x, adj, w1, w2


def _rel_err(a, b):
    return float(jnp.max(jnp.abs(a - b)) / (jnp.max(jnp.abs(b)) + 1e-9))


if __name__ == "__main__":
    key = jax.random.PRNGKey(0)
    k1, k2 = jax.random.split(key)

    # Case 1: small graph -> fused single-call path (adj resident, read once).
    N, NFEAT, NHID1, NOUT = 64, 32, 16, 8
    x, adj, w1, w2 = _make_inputs(k1, N, NFEAT, NHID1, NOUT)
    out = jax.block_until_ready(gcn_forward(x, adj, w1, w2, dropout=0.0))
    ref = _ref_forward(x, adj, w1, w2)
    assert out.shape == (N, NOUT)
    err = _rel_err(out, ref)
    assert err < 4e-2, f"fused path rel err = {err}"

    # Case 2: force the streamed two-pass path (adj row tiles, 3-deep buffer,
    # "parallel" row axis) so the large-graph code path is also exercised.
    N2, NFEAT2, NHID2, NOUT2 = 320, 96, 32, 10
    x, adj, w1, w2 = _make_inputs(k2, N2, NFEAT2, NHID2, NOUT2)
    out = jax.block_until_ready(
        gcn_forward(x, adj, w1, w2, dropout=0.0, force_tiled=True, tm_max=128))
    ref = _ref_forward(x, adj, w1, w2)
    assert out.shape == (N2, NOUT2)
    err = _rel_err(out, ref)
    assert err < 4e-2, f"tiled path rel err = {err}"

    print("KERNEL_OK")
</pallas_src>

<mosaic_0001>
module attributes {stable_mosaic.version = 11 : i64} {
  func.func @_fused_gcn_kernel(%arg0: memref<64x64xbf16, #tpu.memory_space<vmem>>, %arg1: memref<64x128xbf16, #tpu.memory_space<vmem>>, %arg2: memref<128x128xbf16, #tpu.memory_space<vmem>>, %arg3: memref<64x128xf32, #tpu.memory_space<vmem>>) attributes {dimension_semantics = [], scalar_prefetch = 0 : i64, scratch_operands = 0 : i64, tpu.core_type = #tpu.core_type<tc>} {
    %c0 = arith.constant 0 : index
    %c0_0 = arith.constant 0 : index
    %0 = vector.load %arg0[%c0, %c0_0] : memref<64x64xbf16, #tpu.memory_space<vmem>>, vector<64x64xbf16>
    %c0_1 = arith.constant 0 : index
    %c0_2 = arith.constant 0 : index
    %1 = vector.load %arg1[%c0_1, %c0_2] : memref<64x128xbf16, #tpu.memory_space<vmem>>, vector<64x128xbf16>
    %cst = arith.constant dense<0.000000e+00> : vector<64x128xf32>
    %2 = tpu.matmul %0, %1, %cst {dimension_numbers = #tpu.dot_dimension_numbers<[1], [0], [0], [1], [0, 0, 1, 1], [], []>} : vector<64x64xbf16>, vector<64x128xbf16>, vector<64x128xf32> -> vector<64x128xf32>
    %cst_3 = arith.constant 0.000000e+00 : f32
    %3 = vector.broadcast %cst_3 : f32 to vector<64x128xf32>
    %4 = arith.maximumf %2, %3 : vector<64x128xf32>
    %5 = arith.truncf %4 : vector<64x128xf32> to vector<64x128xbf16>
    %c0_4 = arith.constant 0 : index
    %c0_5 = arith.constant 0 : index
    %6 = vector.load %arg2[%c0_4, %c0_5] : memref<128x128xbf16, #tpu.memory_space<vmem>>, vector<128x128xbf16>
    %cst_6 = arith.constant dense<0.000000e+00> : vector<64x128xf32>
    %7 = tpu.matmul %5, %6, %cst_6 {dimension_numbers = #tpu.dot_dimension_numbers<[1], [0], [0], [1], [0, 0, 1, 1], [], []>} : vector<64x128xbf16>, vector<128x128xbf16>, vector<64x128xf32> -> vector<64x128xf32>
    %8 = arith.truncf %7 : vector<64x128xf32> to vector<64x128xbf16>
    %cst_7 = arith.constant dense<0.000000e+00> : vector<64x128xf32>
    %9 = tpu.matmul %0, %8, %cst_7 {dimension_numbers = #tpu.dot_dimension_numbers<[1], [0], [0], [1], [0, 0, 1, 1], [], []>} : vector<64x64xbf16>, vector<64x128xbf16>, vector<64x128xf32> -> vector<64x128xf32>
    %c0_8 = arith.constant 0 : index
    %c0_9 = arith.constant 0 : index
    %10 = vector.load %arg3[%c0_8, %c0_9] : memref<64x128xf32, #tpu.memory_space<vmem>>, vector<64x128xf32>
    tpu.vector_store %arg3[%c0_8, %c0_9], %9 {strides = array<i32>} : memref<64x128xf32, #tpu.memory_space<vmem>>, vector<64x128xf32>,
    return
  }
}

</mosaic_0001>

<bundles_post_ra>
// kernel: tpu_custom_call.1
= control target key start
LH: loop header
LB: loop body
LE: loop exit
PB: predicated region body
PF: predicated region fallthrough
CT: control target
= control target key end

     0   :  { %8 = vsyncpa [#allocation3], 0  ;;  %s593_s0 = inlined_call_operand.hbm [shape: bf16[64,64], index: 0, kind: input, shape index: {}]   ;;  %s594_s1 = inlined_call_operand.hbm [shape: bf16[64,128], index: 1, kind: input, shape index: {}]   ;;  %s595_s2 = inlined_call_operand.hbm [shape: bf16[128,128], index: 2, kind: input, shape index: {}]   ;;  %s596_s3 = inlined_call_operand.hbm [shape: f32[64,128], index: 3, kind: output, shape index: {}]  }
   0x1   :  { %9 = vsyncpa [#allocation6], 0 }
   0x2   :  { %10 = vsyncpa [#allocation4], 0  ;;  %s28_s14 = sshll.u32 %s594_s1, 4  ;;  %s537_s15 = smov [#allocation5]   ;;  %s29_s14 = int_to_ptr.hbm [resolvable:$true] %s28_s14 }
   0x3   :  { %s30_s16 = sshll.u32 %s537_s15, 4  ;;  %s15_s19 = sshll.u32 %s593_s0, 4  ;;  %s31_s16 = int_to_ptr.vmem [resolvable:$true] %s30_s16  ;;  %s16_s19 = int_to_ptr.hbm [resolvable:$true] %s15_s19 }
   0x4   :  { %s538_s20 = smov 64   ;;  %s539_s21 = smov 4  }
   0x5   :  { %36 = dma.hbm_to_vmem [thread:$0]  %s29_s14, 512, %s31_s16, [#allocation6], %s538_s20, %s538_s20, %s539_s21  }
   0x6   :  { %s540_s22 = smov [#allocation2]   ;;  %s41_s26 = sshll.u32 %s595_s2, 4  ;;  %s42_s26 = int_to_ptr.hbm [resolvable:$true] %s41_s26 }
   0x7   :  { %s17_s23 = sshll.u32 %s540_s22, 4  ;;  %s541_s1 = smov [#allocation7]   ;;  %s18_s23 = int_to_ptr.vmem [resolvable:$true] %s17_s23 }
   0x8   :  { %23 = dma.hbm_to_vmem [thread:$0]  %s16_s19, 512, %s18_s23, [#allocation3], %s538_s20, %s538_s20, %s539_s21  }
   0x9   :  { %s43_s27 = sshll.u32 %s541_s1, 4  ;;  %s44_s27 = int_to_ptr.vmem [resolvable:$true] %s43_s27 }
   0xa   :  { %49 = dma.hbm_to_vmem [thread:$0]  %s42_s26, 1024, %s44_s27, [#allocation6], %s538_s20, %s538_s20, %s539_s21  }
   0xb   :  { %531 = dma.done.wait [#allocation3], 512  }
   0xc   :  { %532 = vsyncadd [#allocation3], 4294966784 }
   0xd   :  { %533 = dma.done.wait [#allocation6], 1536  }
   0xe   :  { %534 = vsyncadd [#allocation6], 4294965760  ;;  %v410_v0 = vld [vmem:[#allocation5 + $0x18] sm:$0xff]  ;;  %v409_v1 = vld [vmem:[#allocation5 + $0x10] sm:$0xff]  ;;  %vm123_vm0 = vcmask 523264   ;;  %s542_s0 = smov [#allocation8]  }
   0xf   :  { %140 = vmatpush.bf16.msra.mxu0 %v410_v0  ;;  %v408_v2 = vld [vmem:[#allocation5 + $0x8] sm:$0xff]  ;;  %v407_v3 = vld [vmem:[#allocation5] sm:$0xff]  ;;  %v418_v6 = vld [vmem:[#allocation7 + $0x38] sm:$0xff]  ;;  %s315_s2 = sshll.u32 %s542_s0, 4  ;;  %s317_s30 = sshll.u32 %s596_s3, 4  ;;  %s316_s2 = int_to_ptr.vmem [resolvable:$true] %s315_s2  ;;  %s318_s30 = int_to_ptr.hbm [resolvable:$true] %s317_s30 }
  0x10   :  { %v574_v4 = vld [vmem:[#allocation2] sm:$0xff]  ;;  %v578_v5 = vld [vmem:[#allocation2 + $0x8] sm:$0xff]  ;;  %241 = vmatpush.bf16.msra.mxu1 %v418_v6  ;;  %v417_v7 = vld [vmem:[#allocation7 + $0x30] sm:$0xff]  ;;  %419 = vmatpush.bf16.msra.mxu3 %v418_v6  ;;  %s543_s4 = smov 128   ;;  %s544_s5 = smov 8  }
  0x11   :  { %v416_v8 = vld [vmem:[#allocation7 + $0x28] sm:$0xff]  ;;  %v415_v9 = vld [vmem:[#allocation7 + $0x20] sm:$0xff]  ;;  %v405_v10 = vld [vmem:[#allocation2 + $0x10] sm:$0xff] }
  0x12   :  { %v414_v11 = vld [vmem:[#allocation7 + $0x18] sm:$0xff]  ;;  %v413_v13 = vld [vmem:[#allocation7 + $0x10] sm:$0xff]  ;;  %v412_v14 = vld [vmem:[#allocation7 + $0x8] sm:$0xff] }
  0x13   :  { %141 = vmatpush.bf16.msra.mxu0 %v409_v1  ;;  %v406_v12 = vld [vmem:[#allocation2 + $0x18] sm:$0xff]  ;;  %v411_v15 = vld [vmem:[#allocation7] sm:$0xff] }
  0x14   :  { %242 = vmatpush.bf16.msra.mxu1 %v417_v7  ;;  %420 = vmatpush.bf16.msra.mxu3 %v417_v7 }
  0x17   :  { %142 = vmatpush.bf16.msra.mxu0 %v408_v2 }
  0x18   :  { %243 = vmatpush.bf16.msra.mxu1 %v416_v8  ;;  %421 = vmatpush.bf16.msra.mxu3 %v416_v8 }
  0x1b   :  { %143 = vmatpush.bf16.msra.mxu0 %v407_v3 }
  0x1c   :  { %244 = vmatpush.bf16.msra.mxu1 %v415_v9  ;;  %422 = vmatpush.bf16.msra.mxu3 %v415_v9 }
  0x1e   :  { %363 = vmatmul.msk.bf16.vlgmr.msra.gmra.mxu0 %vm123_vm0, %v574_v4 }
  0x20   :  { %245 = vmatpush.bf16.msra.mxu1 %v414_v11  ;;  %423 = vmatpush.bf16.msra.mxu3 %v414_v11 }
  0x24   :  { %246 = vmatpush.bf16.msra.mxu1 %v413_v13  ;;  %424 = vmatpush.bf16.msra.mxu3 %v413_v13 }
  0x28   :  { %247 = vmatpush.bf16.msra.mxu1 %v412_v14  ;;  %425 = vmatpush.bf16.msra.mxu3 %v412_v14 }
  0x2c   :  { %248 = vmatpush.bf16.msra.mxu1 %v411_v15  ;;  %426 = vmatpush.bf16.msra.mxu3 %v411_v15 }
  0x2e   :  { %364 = vmatmul.msk.bf16.gmra.mxu0 %vm123_vm0, %v578_v5 }
  0x3e   :  { %365 = vmatmul.msk.bf16.gmra.mxu0 %vm123_vm0, %v405_v10 }
  0x4e   :  { %366 = vmatmul.msk.bf16.gmra.mxu0 %vm123_vm0, %v406_v12 }
  0x9b   :  { %v145_v16 = vpop.f32.mrf.mxu0 }
  0x9c   :  { %v165_v18 = vmax.f32 %v145_v16, 0.0 }
  0xa3   :  { %v147_v17 = vpop.f32.mrf.mxu0 }
  0xa4   :  { %v166_v19 = vmax.f32 %v147_v17, 0.0 }
  0xa6   :  { %v173_v20 = vpack.c.bf16 %v166_v19, %v165_v18 }
  0xa8   :  { %249 = vmatmul.bf16.vlgmr.msra.gmra.mxu1 %v173_v20 }
  0xab   :  { %v150_v21 = vpop.f32.mrf.mxu0 }
  0xac   :  { %v167_v23 = vmax.f32 %v150_v21, 0.0 }
  0xb3   :  { %v152_v22 = vpop.f32.mrf.mxu0 }
  0xb4   :  { %v168_v24 = vmax.f32 %v152_v22, 0.0 }
  0xb6   :  { %v174_v25 = vpack.c.bf16 %v168_v24, %v167_v23 }
  0xb8   :  { %254 = vmatmul.bf16.vlgmr.msra.gmra.mxu3 %v174_v25 }
  0xbb   :  { %v155_v26 = vpop.f32.mrf.mxu0 }
  0xbc   :  { %v169_v28 = vmax.f32 %v155_v26, 0.0 }
  0xc3   :  { %v157_v27 = vpop.f32.mrf.mxu0 }
  0xc4   :  { %v170_v29 = vmax.f32 %v157_v27, 0.0 }
  0xc6   :  { %v175_v30 = vpack.c.bf16 %v170_v29, %v169_v28 }
  0xc8   :  { %259 = vmatmul.bf16.gmra.mxu3 %v175_v30 }
  0xcb   :  { %v160_v31 = vpop.f32.mrf.mxu0 }
  0xcc   :  { %v171_v33 = vmax.f32 %v160_v31, 0.0 }
  0xd3   :  { %v162_v32 = vpop.f32.mrf.mxu0 }
  0xd4   :  { %v172_v34 = vmax.f32 %v162_v32, 0.0 }
  0xd6   :  { %v176_v35 = vpack.c.bf16 %v172_v34, %v171_v33 }
  0xd8   :  { %264 = vmatmul.bf16.gmra.mxu3 %v176_v35 }
 0x125   :  { %v250_v41 = vpop.f32.mrf.mxu1 }
 0x12d   :  { %v252_v46 = vpop.f32.mrf.mxu1 }
 0x12e   :  { %v270_v47 = vpack.c.bf16 %v252_v46, %v250_v41 }
 0x13b   :  { %v255_v36 = vpop.f32.mrf.mxu3 }
 0x143   :  { %v257_v37 = vpop.f32.mrf.mxu3 }
 0x144   :  { %v271_v45 = vpack.c.bf16 %v257_v37, %v255_v36 }
 0x14b   :  { %v260_v38 = vpop.f32.mrf.mxu3 }
 0x153   :  { %v262_v39 = vpop.f32.mrf.mxu3 }
 0x154   :  { %v272_v44 = vpack.c.bf16 %v262_v39, %v260_v38 }
 0x15b   :  { %v265_v40 = vpop.f32.mrf.mxu3 }
 0x163   :  { %v267_v42 = vpop.f32.mrf.mxu3 }
 0x164   :  { %v273_v43 = vpack.c.bf16 %v267_v42, %v265_v40 }
 0x166   :  { %278 = vmatpush.bf16.msra.mxu2 %v273_v43 }
 0x16a   :  { %279 = vmatpush.bf16.msra.mxu2 %v272_v44 }
 0x16e   :  { %280 = vmatpush.bf16.msra.mxu2 %v271_v45 }
 0x172   :  { %281 = vmatpush.bf16.msra.mxu2 %v270_v47 }
 0x175   :  { %399 = vmatmul.msk.bf16.vlgmr.msra.gmra.mxu2 %vm123_vm0, %v574_v4 }
 0x185   :  { %400 = vmatmul.msk.bf16.gmra.mxu2 %vm123_vm0, %v578_v5 }
 0x195   :  { %401 = vmatmul.msk.bf16.gmra.mxu2 %vm123_vm0, %v405_v10 }
 0x1a5   :  { %402 = vmatmul.msk.bf16.gmra.mxu2 %vm123_vm0, %v406_v12 }
 0x1f8   :  { %v283_v48 = vpop.f32.mrf.mxu2 }
 0x1f9   :  { %303 = vst [vmem:[#allocation8] sm:$0xff] %v283_v48 }
 0x200   :  { %v285_v49 = vpop.f32.mrf.mxu2 }
 0x201   :  { %304 = vst [vmem:[#allocation8 + $0x8] sm:$0xff] %v285_v49 }
 0x208   :  { %v288_v50 = vpop.f32.mrf.mxu2 }
 0x209   :  { %305 = vst [vmem:[#allocation8 + $0x10] sm:$0xff] %v288_v50 }
 0x210   :  { %v290_v51 = vpop.f32.mrf.mxu2 }
 0x211   :  { %306 = vst [vmem:[#allocation8 + $0x18] sm:$0xff] %v290_v51 }
 0x218   :  { %v293_v52 = vpop.f32.mrf.mxu2 }
 0x219   :  { %307 = vst [vmem:[#allocation8 + $0x20] sm:$0xff] %v293_v52 }
 0x220   :  { %v295_v53 = vpop.f32.mrf.mxu2 }
 0x221   :  { %308 = vst [vmem:[#allocation8 + $0x28] sm:$0xff] %v295_v53 }
 0x228   :  { %v298_v54 = vpop.f32.mrf.mxu2 }
 0x229   :  { %309 = vst [vmem:[#allocation8 + $0x30] sm:$0xff] %v298_v54 }
 0x230   :  { %v300_v55 = vpop.f32.mrf.mxu2 }
 0x231   :  { %310 = vst [vmem:[#allocation8 + $0x38] sm:$0xff] %v300_v55 }
 0x232   :  { %323 = dma.vmem_to_hbm [thread:$0]  %s316_s2, 1024, %s318_s30, [#allocation4], %s543_s4, %s543_s4, %s544_s5  }
 0x233   :  { %535 = dma.done.wait [#allocation4], 1024  }
 0x234   :  { %536 = vsyncadd [#allocation4], 4294966272 }
 0x235   :  { %328 = vsyncpa [#allocation3], 1 }
 0x236   :  { %329 = vsyncpa [#allocation6], 1 }
 0x237   :  { %330 = vsyncpa [#allocation4], 1 }

</bundles_post_ra>
